<compile_context>
chip_gen: v7x
topology: tpu7x:2x2x1
jax: 0.10.0
libtpu: 0.0.40
codegen_flags: <defaults>
</compile_context>

<pallas_src>
import functools

import jax
import jax.numpy as jnp
from jax.experimental import pallas as pl
from jax.experimental.pallas import tpu as pltpu


# ----------------------------- index glue (static) -----------------------------
def correspondence_li(two_dimensional_list):
    return [i for i, sublist in enumerate(two_dimensional_list) for _ in sublist]


def transform_u(u, batch):
    start_indices = {}
    current = None
    for i, b in enumerate(batch):
        if b != current:
            start_indices[b] = i
            current = b
    return [start_indices[i] + idx for i, idx in enumerate(u)]


def transform_v_li(v_li, batch):
    start_indices = {}
    current = None
    for i, b in enumerate(batch):
        if b != current:
            start_indices[b] = i
            current = b
    v_new = [[start_indices[i] + idx for idx in sub] for i, sub in enumerate(v_li)]
    return [item for sub in v_new for item in sub]


def split_tensor(t, corres):
    corres = jnp.asarray(corres)
    uniq = sorted(set(int(c) for c in corres.tolist()))
    return [t[corres == idx] for idx in uniq]


def _round_up(x, m):
    return (x + m - 1) // m * m


# --------------------------------- kernel --------------------------------------
def _bilinear_decoder_kernel(row_ref, wenc_ref, benc_ref, wg_ref, bdec_ref, out_ref,
                             *, num_features, d_in):
    f32 = jnp.float32

    blk = row_ref[...]                                       # (R, F + 2*d_in) f32, one DMA
    tx = blk[:, :num_features]                               # candidate-row features
    b_row = blk[:, num_features:num_features + d_in]         # per-row folded bilinear table
    g_blk = blk[:, num_features + d_in:]                     # per-row graph embedding

    # ---- encoder on candidate rows: bf16 MXU operands, f32 accumulation,
    #      bias + ReLU on the VPU in f32 (v5e-safe).
    t_lat = jnp.dot(tx.astype(wenc_ref.dtype), wenc_ref[...],
                    preferred_element_type=f32)
    t_lat = jnp.maximum(t_lat + benc_ref[...], 0.0)          # (R, d_in) f32

    # ---- bilinear score with w_dec already folded in:
    #        bil[i] = sum_l b_row[i, l] * t_lat[i, l]        (pure VPU multiply)
    z = b_row * t_lat                                        # (R, d_in) f32

    # ---- lane-dense (1, R) epilogue: (1, d_in) x (R, d_in)^T dots produce the
    #      output row directly -> unmasked lane-dense stores, no XLU reductions.
    dims = (((1,), (1,)), ((), ()))
    ones_row = jnp.ones((1, d_in), f32)
    bil = jax.lax.dot_general(ones_row, z, dims, preferred_element_type=f32)
    gpt = jax.lax.dot_general(wg_ref[...], g_blk, dims, preferred_element_type=f32)
    out_ref[...] = bil + gpt + bdec_ref[...]                 # (1, R)


def bilinear_decoder_pallas(u_emb, tx, corres, g_sp,
                            w_enc, b_enc, w_bil, w_dec, b_dec,
                            *, block_rows=1024, mxu_dtype=jnp.bfloat16):
    """sim = decoder(cat([bilinear(enc(u)[corres], enc(tx)), g_sp])) as a Pallas kernel."""
    n, num_features = tx.shape
    d_in = w_enc.shape[1]
    d_out = w_bil.shape[2]
    f32 = jnp.float32
    hi = jax.lax.Precision.HIGHEST

    # ---- trace-time folds & per-graph work (tiny, plain XLA; runs once) -------
    # Fold the decoder weight over d_out into the bilinear tensor.
    w_fold = jnp.einsum('klj,j->kl', w_bil.astype(f32),
                        w_dec[:d_out, 0].astype(f32), precision=hi)       # (d_in, d_in)
    # Encode the few unique query rows once; build the folded per-graph table.
    u_lat = jnp.maximum(
        jnp.dot(u_emb.astype(mxu_dtype), w_enc.astype(mxu_dtype),
                preferred_element_type=f32) + b_enc.astype(f32), 0.0)     # (G, d_in)
    b_g = jnp.dot(u_lat, w_fold, precision=hi)                            # (G, d_in) f32
    corres_arr = jnp.asarray(corres, jnp.int32)
    b_row = b_g[corres_arr]                                               # (N, d_in)

    # Merge all per-row streamed operands into one lane-contiguous block:
    #   [ tx (F) | b_row (d_in) | g_sp (d_in) ]  -> single DMA per grid step.
    row_blk = jnp.concatenate([tx.astype(f32), b_row, g_sp.astype(f32)], axis=1)
    ncols = num_features + 2 * d_in

    # ---- tiling: big tiles (amortize ~0.35us/step), rows multiple of 128, and
    #      always >= 2 grid steps so both v7x TensorCores get work. ------------
    block_rows = _round_up(max(int(block_rows), 128), 128)
    block_rows = min(block_rows, max(128, _round_up(pl.cdiv(n, 2), 128)))
    n_pad = block_rows * max(2, pl.cdiv(n, block_rows))
    grid = (n_pad // block_rows,)

    row_p = jnp.pad(row_blk, ((0, n_pad - n), (0, 0)))

    w_enc_c = w_enc.astype(mxu_dtype)                                     # (F, d_in)
    b_enc_r = b_enc.reshape(1, d_in).astype(f32)
    w_g_r = w_dec[d_out:, 0].reshape(1, d_in).astype(f32)
    b_dec_r = b_dec.reshape(1, 1).astype(f32)

    kernel = functools.partial(_bilinear_decoder_kernel,
                               num_features=num_features, d_in=d_in)

    full = lambda i: (0, 0)     # resident weights (constant index map)
    row = lambda i: (i, 0)      # row-tiled candidate stream

    scores = pl.pallas_call(
        kernel,
        out_shape=jax.ShapeDtypeStruct((1, n_pad), jnp.float32),
        grid_spec=pltpu.PrefetchScalarGridSpec(
            num_scalar_prefetch=0,
            grid=grid,
            in_specs=[
                pl.BlockSpec((block_rows, ncols), row),     # merged [tx | b_row | g_sp]
                pl.BlockSpec((num_features, d_in), full),   # w_enc (bf16)
                pl.BlockSpec((1, d_in), full),              # b_enc (f32)
                pl.BlockSpec((1, d_in), full),              # w_dec[d_out:] row (f32)
                pl.BlockSpec((1, 1), full),                 # b_dec
            ],
            out_specs=pl.BlockSpec((1, block_rows), lambda i: (0, i)),
        ),
        compiler_params=pltpu.CompilerParams(
            dimension_semantics=("parallel",)),
    )(row_p, w_enc_c, b_enc_r, w_g_r, b_dec_r)

    # back to the module's (N, 1) "sim" layout
    return scores[0, :n].reshape(n, 1)


# --------------------------------- driver --------------------------------------
if __name__ == "__main__":
    num_graphs = 2
    num_nodes = 10
    num_features = 5
    d_in = 16
    d_out = 16

    key = jax.random.PRNGKey(0)
    k_x, k_g, k_we, k_be, k_wb, k_wd, k_bd = jax.random.split(key, 7)

    # graph data (matches the PyTorch test script)
    x = jax.random.normal(k_x, (num_nodes * num_graphs, num_features), jnp.float32)
    g_emb = jax.random.normal(k_g, (num_graphs, d_in), jnp.float32)
    batch = [i // num_nodes for i in range(num_nodes * num_graphs)]
    u = [0, 5]
    v_li = [[1, 2, 3], [6, 7, 8]]

    # parameters: encoder Linear(F, d_in)+ReLU, bilinear_mat, decoder Linear(d_out+d_in, 1)
    w_enc = jax.random.normal(k_we, (num_features, d_in), jnp.float32) * 0.1
    b_enc = jax.random.normal(k_be, (d_in,), jnp.float32) * 0.1
    w_bil = (jax.random.normal(k_wb, (d_in, d_in, d_out), jnp.float32)
             + jnp.eye(d_in, dtype=jnp.float32)[:, :, None])
    w_dec = jax.random.normal(k_wd, (d_out + d_in, 1), jnp.float32) * 0.1
    b_dec = jax.random.normal(k_bd, (1,), jnp.float32) * 0.1

    # forward() index bookkeeping (static glue, mirrors the PyTorch module)
    v_corres = correspondence_li(v_li)                 # [0,0,0,1,1,1]
    u_t = transform_u(u, batch)                        # [0,15]
    v_flat = transform_v_li(v_li, batch)               # [1,2,3,16,17,18]

    u_emb = x[jnp.asarray(u_t)]                        # (num_graphs, F) unique query rows
    tx = x[jnp.asarray(v_flat)]                        # (N, F) target rows
    g_sp = g_emb[jnp.asarray(v_corres)]                # (N, d_in)

    sim = bilinear_decoder_pallas(u_emb, tx, v_corres, g_sp,
                                  w_enc, b_enc, w_bil, w_dec, b_dec)
    sim = jax.block_until_ready(sim)

    # reference #1: original (unfolded) math with the same bf16 encoder-operand casts
    # as the kernel uses -> tight tolerance (w_dec fold only changes f32 sum order).
    cast = lambda a: a.astype(jnp.bfloat16).astype(jnp.float32)
    q_lat = jnp.maximum(cast(u_emb) @ cast(w_enc) + b_enc, 0.0)
    t_lat = jnp.maximum(cast(tx) @ cast(w_enc) + b_enc, 0.0)
    qc = q_lat[jnp.asarray(v_corres)]
    a_ref = jnp.einsum('ik,klj->ilj', qc, w_bil, precision=jax.lax.Precision.HIGHEST)
    sim_latent = (a_ref * t_lat[:, :, None]).sum(axis=1)
    zcat = jnp.concatenate([sim_latent, g_sp], axis=1)
    sim_ref = zcat @ w_dec + b_dec
    assert jnp.allclose(sim, sim_ref, rtol=2e-3, atol=2e-3), "mismatch vs bf16-cast reference"

    # reference #2: pure-f32 original formulation -> loose sanity bound for the bf16 MXU path
    q_lat32 = jnp.maximum(u_emb @ w_enc + b_enc, 0.0)
    t_lat32 = jnp.maximum(tx @ w_enc + b_enc, 0.0)
    a32 = jnp.einsum('ik,klj->ilj', q_lat32[jnp.asarray(v_corres)], w_bil,
                     precision=jax.lax.Precision.HIGHEST)
    sim_latent32 = (a32 * t_lat32[:, :, None]).sum(axis=1)
    sim_ref32 = jnp.concatenate([sim_latent32, g_sp], axis=1) @ w_dec + b_dec
    assert jnp.allclose(sim, sim_ref32, rtol=5e-2, atol=5e-2), "mismatch vs f32 reference"

    # split_tensor(sim.view(-1), v_corres) -- per-graph outputs (host-side glue)
    splits = split_tensor(sim.reshape(-1), v_corres)
    for out in splits:
        _ = jnp.zeros(out.shape)  # policy_truth placeholder, as in the PyTorch snippet

    print("KERNEL_OK")
</pallas_src>

<mosaic_0001>
module attributes {stable_mosaic.version = 11 : i64} {
  func.func @_bilinear_decoder_kernel(%arg0: i32, %arg1: memref<128x37xf32, #tpu.memory_space<vmem>>, %arg2: memref<5x16xbf16, #tpu.memory_space<vmem>>, %arg3: memref<1x16xf32, #tpu.memory_space<vmem>>, %arg4: memref<1x16xf32, #tpu.memory_space<vmem>>, %arg5: memref<1x1xf32, #tpu.memory_space<vmem>>, %arg6: memref<1x128xf32, #tpu.memory_space<vmem>>) attributes {dimension_semantics = [#tpu.dimension_semantics<parallel>], iteration_bounds = array<i64: 2>, scalar_prefetch = 0 : i64, scratch_operands = 0 : i64, tpu.core_type = #tpu.core_type<tc>, window_params = [{transform_indices = @transform_0, window_bounds = array<i64: 128, 37>}, {pipeline_mode = #tpu.pipeline_mode<synchronous>, transform_indices = @transform_1, window_bounds = array<i64: 5, 16>}, {pipeline_mode = #tpu.pipeline_mode<synchronous>, transform_indices = @transform_2, window_bounds = array<i64: 1, 16>}, {pipeline_mode = #tpu.pipeline_mode<synchronous>, transform_indices = @transform_3, window_bounds = array<i64: 1, 16>}, {pipeline_mode = #tpu.pipeline_mode<synchronous>, transform_indices = @transform_4, window_bounds = array<i64: 1, 1>}, {transform_indices = @transform_5, window_bounds = array<i64: 1, 128>}]} {
    %c0 = arith.constant 0 : index
    %c0_0 = arith.constant 0 : index
    %0 = vector.load %arg1[%c0, %c0_0] : memref<128x37xf32, #tpu.memory_space<vmem>>, vector<128x37xf32>
    %1 = vector.extract_strided_slice %0 {offsets = [0, 0], sizes = [128, 5], strides = [1, 1]} : vector<128x37xf32> to vector<128x5xf32>
    %2 = vector.extract_strided_slice %0 {offsets = [0, 5], sizes = [128, 16], strides = [1, 1]} : vector<128x37xf32> to vector<128x16xf32>
    %3 = vector.extract_strided_slice %0 {offsets = [0, 21], sizes = [128, 16], strides = [1, 1]} : vector<128x37xf32> to vector<128x16xf32>
    %4 = arith.truncf %1 : vector<128x5xf32> to vector<128x5xbf16>
    %c0_1 = arith.constant 0 : index
    %c0_2 = arith.constant 0 : index
    %5 = vector.load %arg2[%c0_1, %c0_2] : memref<5x16xbf16, #tpu.memory_space<vmem>>, vector<5x16xbf16>
    %cst = arith.constant dense<0.000000e+00> : vector<128x16xf32>
    %6 = tpu.matmul %4, %5, %cst {dimension_numbers = #tpu.dot_dimension_numbers<[1], [0], [0], [1], [0, 0, 1, 1], [], []>} : vector<128x5xbf16>, vector<5x16xbf16>, vector<128x16xf32> -> vector<128x16xf32>
    %c0_3 = arith.constant 0 : index
    %c0_4 = arith.constant 0 : index
    %7 = vector.load %arg3[%c0_3, %c0_4] : memref<1x16xf32, #tpu.memory_space<vmem>>, vector<1x16xf32>
    %8 = vector.broadcast %7 : vector<1x16xf32> to vector<128x16xf32>
    %9 = arith.addf %6, %8 : vector<128x16xf32>
    %cst_5 = arith.constant 0.000000e+00 : f32
    %10 = vector.broadcast %cst_5 : f32 to vector<128x16xf32>
    %11 = arith.maximumf %9, %10 : vector<128x16xf32>
    %12 = arith.mulf %2, %11 : vector<128x16xf32>
    %cst_6 = arith.constant 1.000000e+00 : f32
    %13 = vector.broadcast %cst_6 : f32 to vector<1x16xf32>
    %cst_7 = arith.constant dense<0.000000e+00> : vector<1x128xf32>
    %14 = tpu.matmul %13, %12, %cst_7 {dimension_numbers = #tpu.dot_dimension_numbers<[1], [1], [0], [0], [0, 0, 1, 0], [], []>} : vector<1x16xf32>, vector<128x16xf32>, vector<1x128xf32> -> vector<1x128xf32>
    %c0_8 = arith.constant 0 : index
    %c0_9 = arith.constant 0 : index
    %15 = vector.load %arg4[%c0_8, %c0_9] : memref<1x16xf32, #tpu.memory_space<vmem>>, vector<1x16xf32>
    %cst_10 = arith.constant dense<0.000000e+00> : vector<1x128xf32>
    %16 = tpu.matmul %15, %3, %cst_10 {dimension_numbers = #tpu.dot_dimension_numbers<[1], [1], [0], [0], [0, 0, 1, 0], [], []>} : vector<1x16xf32>, vector<128x16xf32>, vector<1x128xf32> -> vector<1x128xf32>
    %17 = arith.addf %14, %16 : vector<1x128xf32>
    %c0_11 = arith.constant 0 : index
    %c0_12 = arith.constant 0 : index
    %18 = vector.load %arg5[%c0_11, %c0_12] : memref<1x1xf32, #tpu.memory_space<vmem>>, vector<1x1xf32>
    %19 = vector.broadcast %18 : vector<1x1xf32> to vector<1x128xf32>
    %20 = arith.addf %17, %19 : vector<1x128xf32>
    %c0_13 = arith.constant 0 : index
    %c0_14 = arith.constant 0 : index
    %21 = vector.load %arg6[%c0_13, %c0_14] : memref<1x128xf32, #tpu.memory_space<vmem>>, vector<1x128xf32>
    tpu.vector_store %arg6[%c0_13, %c0_14], %20 {strides = array<i32>} : memref<1x128xf32, #tpu.memory_space<vmem>>, vector<1x128xf32>,
    return
  }
  func.func @transform_0(%arg0: i32) -> (i32, i32) {
    %c0_i32 = arith.constant 0 : i32
    %c0_i32_0 = arith.constant 0 : i32
    return %arg0, %c0_i32 : i32, i32
  }
  func.func @transform_1(%arg0: i32) -> (i32, i32) {
    %c0_i32 = arith.constant 0 : i32
    %c0_i32_0 = arith.constant 0 : i32
    %c0_i32_1 = arith.constant 0 : i32
    return %c0_i32, %c0_i32_0 : i32, i32
  }
  func.func @transform_2(%arg0: i32) -> (i32, i32) {
    %c0_i32 = arith.constant 0 : i32
    %c0_i32_0 = arith.constant 0 : i32
    %c0_i32_1 = arith.constant 0 : i32
    return %c0_i32, %c0_i32_0 : i32, i32
  }
  func.func @transform_3(%arg0: i32) -> (i32, i32) {
    %c0_i32 = arith.constant 0 : i32
    %c0_i32_0 = arith.constant 0 : i32
    %c0_i32_1 = arith.constant 0 : i32
    return %c0_i32, %c0_i32_0 : i32, i32
  }
  func.func @transform_4(%arg0: i32) -> (i32, i32) {
    %c0_i32 = arith.constant 0 : i32
    %c0_i32_0 = arith.constant 0 : i32
    %c0_i32_1 = arith.constant 0 : i32
    return %c0_i32, %c0_i32_0 : i32, i32
  }
  func.func @transform_5(%arg0: i32) -> (i32, i32) {
    %c0_i32 = arith.constant 0 : i32
    %c0_i32_0 = arith.constant 0 : i32
    return %c0_i32, %arg0 : i32, i32
  }
}

</mosaic_0001>

<bundles_post_ra>
// kernel: tpu_custom_call.1
= control target key start
LH: loop header
LB: loop body
LE: loop exit
PB: predicated region body
PF: predicated region fallthrough
CT: control target
= control target key end

     0   :  { %s1649_s0 = inlined_call_operand.vmem [shape: f32[256,37], index: 0, kind: input, shape index: {}]   ;;  %s1650_s1 = inlined_call_operand.vmem [shape: bf16[5,16], index: 1, kind: input, shape index: {}]   ;;  %s1651_s2 = inlined_call_operand.vmem [shape: f32[1,16], index: 2, kind: input, shape index: {}]   ;;  %s1652_s3 = inlined_call_operand.vmem [shape: f32[1,16], index: 3, kind: input, shape index: {}]   ;;  %s1653_s4 = inlined_call_operand.<no memory space> [shape: f32[1,1], index: 4, kind: input, shape index: {}]   ;;  %s1654_s5 = inlined_call_operand.hbm [shape: f32[1,256], index: 5, kind: output, shape index: {}]  }
   0x1   :  { %v10_v0 = vstv %s1653_s4 }
   0x2   :  { %11 = vst [vmem:[#allocation2] sm:$0x1] %v10_v0 }
   0x3   :  { %12 = vsyncpa [#allocation4], 0 }
   0x4   :  { %14 = vsyncpa [#allocation4 + $0x1], 0  ;;  %s1355_s20 = smov 0   ;;  %s1357_s21 = smov 0  }
   0x5   :  { %s1359_s22 = smov 0   ;;  %s1361_s23 = smov 0  }
   0x6 LB: > { %s871_s4 = sadd.s32 4294967295, %s1310_s23   ;;  %s872_s24 = sadd.s32 4294967294, %s1310_s23   ;;  %s1310_s23 = sphi %s1361_s23, %s1662_s23   ;;  %s1306_s22 = sphi %s1359_s22, %s1661_s22   ;;  %s1302_s21 = sphi %s1357_s21, %s1660_s21   ;;  %s1298_s20 = sphi %s1355_s20, %s1659_s20  }
   0x7   : > { %s1378_s25 = sadd.s32 1, %s1310_s23   ;;  %s137_s26 = sadd.s32 1, %s1306_s22 }
   0x8   : > { %s134_s27 = ssub.s32 %s1310_s23, %s1378_s25  ;;  %p147_p0 = scmp.ne.s32.totalorder %s1306_s22, %s1302_s21 }
   0x9   : > { %p135_p1 = scmp.eq.s32.totalorder %s134_s27, 0  ;;  %p148_p2 = scmp.eq.s32.totalorder %s871_s4, 1 }
   0xa   : > { %p153_p3 = scmp.ne.s32.totalorder %s1302_s21, %s1298_s20  ;;  %p154_p4 = scmp.eq.s32.totalorder %s872_s24, 1 }
   0xb   : > { %s1388_s28 = scalar_select %p135_p1, %s1306_s22, %s137_s26  }
   0xc   : > { %p1390_p5 = por %p148_p2, %p147_p0  ;;  %p1394_p6 = por %p154_p4, %p153_p3 }
   0xd   : > { %p875_p7 = scmp.ge.s32.totalorder %s1310_s23, 1  ;;  %p193_p8 = scmp.lt.s32.totalorder %s1310_s23, 3 }
   0xf   : > { %p194_p9 = pnand %p875_p7, %p193_p8 }
  0x10   : > { %v251_v1 = vld [vmem:[%s1650_s1] sm:$0x7] (!%p194_p9)  ;;  %vm284_vm0 = vcmask (!%p194_p9), 1041408   ;;  %vm285_vm1 = vcmask (!%p194_p9), 1042432   ;;  %s1403_s8 = sshll.u32 (!%p194_p9), %s871_s4, 4  ;;  %v1312_v2 = vmov (!%p194_p9), 65535  }
  0x11   : > { %197 = sbr.rel (%p194_p9) target bundleno = 784 (0x310), region = 40  ;;  %v286_v3 = vsel (!%p194_p9), %vm284_vm0, 4294967295, %v1312_v2  ;;  %p221_p10 = scmp.lt.s32.totalorder (!%p194_p9), %s1403_s8, 31  ;;  %vm259_vm2 = vcmask (!%p194_p9), 39936   ;;  %v878_v30 = vld [vmem:[%s1651_s2] ss:$0 sm:$0xff] (!%p194_p9) }
  0x12   : > { %v287_v4 = vsel (!%p194_p9), %vm285_vm1, %v286_v3, 0  ;;  %s1313_s16 = smov (!%p194_p9), 5   ;;  %s1314_s17 = smov (!%p194_p9), 107   ;;  %vm533_vm3 = vcmask (!%p194_p9), 130048   ;;  %vm1317_vm5 = vmmov (!%p194_p9), 0  }
  0x13   : > { %v289_v5 = vand.u32 (!%p194_p9), %v287_v4, %v251_v1  ;;  %s1316_s18 = smov (!%p194_p9), 123   ;;  %vm1546_vm4 = vmpackc.low (!%p194_p9), %vm533_vm3, %vm533_vm3  ;;  %s218_s24 = sand.u32 (!%p194_p9), 1, %s1302_s21  }
  0x14   : > { %s219_s26 = scalar_lea.vmem (!%p194_p9), [#allocation3], %s218_s24  ;;  %s1321_s12 = smov (!%p194_p9), [#allocation3]  }
  0x15   : > { %967 = vmatprep.subr.bf16.mxu0 (!%p194_p9), %v289_v5  ;;  %s817_s27 = sshll.u32 (!%p194_p9), %s219_s26, 4  ;;  %s1609_s27 = int_to_ptr.vmem [resolvable:$true] %s817_s27 }
  0x16   : > { %968 = vmatpush3.bf16.msra.mxu0 (!%p194_p9), %v289_v5  ;;  %s1248_s11 = scalar_lea.vmem (!%p194_p9), %s1609_s27, 16 }
  0x17   : > { %p1249_p11 = scmp.ne.s32.totalorder (!%p194_p9), %s1609_s27, %s1248_s11 }
  0x18   : > { %s222_s9 = scalar_select %p221_p10, %s1403_s8, 31 }
  0x19   : > { %p1250_p12 = pnand %p1249_p11, %p1390_p5 }
  0x1a   : > { %s877_s10 = sshll.u32 %s222_s9, 3  ;;  %s1607_s9 = scalar_lea.hbm %s1654_s5, %s1403_s8 }
  0x1b   : > { %s1410_s13 = scalar_lea.vmem %s1649_s0, %s877_s10  ;;  %s805_s10 = scalar_lea.sflag [#allocation4], %s218_s24 }
  0x1c   : > { %v1413_v6 = vld [vmem:[%s1410_s13] sm:$0xff]  ;;  %v1416_v7 = vld [vmem:[%s1410_s13 + $0x8] sm:$0xff]  ;;  %v1419_v8 = vld [vmem:[%s1410_s13 + $0x10] sm:$0xff]  ;;  %p1251_p13 = pneg %p1250_p12 }
  0x1d   : > { %v243_v9 = vpack.c.bf16 %v1416_v7, %v1413_v6  ;;  %v1424_v10 = vld [vmem:[%s1410_s13 + $0x18] sm:$0xff]  ;;  %v1427_v11 = vld [vmem:[%s1410_s13 + $0x20] sm:$0xff]  ;;  %v1430_v12 = vld [vmem:[%s1410_s13 + $0x28] sm:$0xff] }
  0x1e   : > { %v244_v13 = vpack.c.bf16 %v1424_v10, %v1419_v8  ;;  %v245_v14 = vpack.c.bf16 %v1430_v12, %v1427_v11  ;;  %v1440_v15 = vld [vmem:[%s1410_s13 + $0x30] sm:$0xff]  ;;  %v1443_v16 = vld [vmem:[%s1410_s13 + $0x38] sm:$0xff]  ;;  %v1446_v17 = vld [vmem:[%s1410_s13 + $0x40] sm:$0xff] }
  0x1f   : > { %969 = vmatprep.mubr.msk.bf16.mxu0 %vm259_vm2, %v243_v9  ;;  %v1449_v18 = vld [vmem:[%s1410_s13 + $0x48] sm:$0xff]  ;;  %v246_v19 = vpack.c.bf16 %v1443_v16, %v1440_v15  ;;  %v1458_v21 = vld [vmem:[%s1410_s13 + $0x50] sm:$0xff]  ;;  %v1461_v22 = vld [vmem:[%s1410_s13 + $0x58] sm:$0xff] }
  0x20   : > { %970 = vmatmul.mubr.msk.bf16.vlgmr.msra.gmra.mrb[0].mxu0 %vm259_vm2, %v244_v13  ;;  %v247_v20 = vpack.c.bf16 %v1449_v18, %v1446_v17  ;;  %v1464_v23 = vld [vmem:[%s1410_s13 + $0x60] sm:$0xff]  ;;  %v1467_v24 = vld [vmem:[%s1410_s13 + $0x68] sm:$0xff]  ;;  %v248_v25 = vpack.c.bf16 %v1461_v22, %v1458_v21  ;;  %v1476_v27 = vld [vmem:[%s1410_s13 + $0x70] sm:$0xff] }
  0x21   : > { %973 = vmatprep.mubr.msk.bf16.mxu0 %vm259_vm2, %v245_v14  ;;  %v249_v26 = vpack.c.bf16 %v1467_v24, %v1464_v23  ;;  %v1479_v28 = vld [vmem:[%s1410_s13 + $0x78] sm:$0xff]  ;;  %s1252_s13 = sshll.u32 %s1321_s12, 4  ;;  %s1253_s13 = int_to_ptr.vmem [resolvable:$false] %s1252_s13 }
  0x22   : > { %v250_v29 = vpack.c.bf16 %v1479_v28, %v1476_v27  ;;  %s1254_s14 = scalar_lea.vmem %s1253_s13, 32  ;;  %p1255_p0 = scmp.lt.s32.totalorder %s1609_s27, %s1253_s13 }
  0x23   : > { %p1256_p1 = scmp.lt.s32.totalorder %s1254_s14, %s1248_s11 }
  0x25   : > { %p1257_p2 = por %p1256_p1, %p1255_p0 }
  0x27   : > { %p1258_p3 = pnand %p1257_p2, %p1251_p13 }
  0x28   : > { %974 = vmatmul.mubr.msk.bf16.gmra.mrb[4].mxu0 %vm259_vm2, %v246_v19 }
  0x29   : > { %977 = vmatprep.mubr.msk.bf16.mxu0 %vm259_vm2, %v247_v20 }
  0x30   : > { %978 = vmatmul.mubr.msk.bf16.gmra.mrb[8].mxu0 %vm259_vm2, %v248_v25 }
  0x31   : > { %981 = vmatprep.mubr.msk.bf16.mxu0 %vm259_vm2, %v249_v26 }
  0x38   : > { %982 = vmatmul.mubr.msk.bf16.gmra.mrb[12].mxu0 %vm259_vm2, %v250_v29 }
  0xf3   : > { %v971_v31 = vpop.f32.mrb[0].mxu0 }
  0xf4   : > { %v334_v32 = vadd.f32 %v971_v31, %v878_v30  ;;  %v325_v33 = vpop.f32.mrb[1].mxu0 }
  0xf5   : > { %v326_v34 = vadd.f32 %v878_v30, %v325_v33  ;;  %v972_v35 = vpop.f32.mrb[2].mxu0  ;;  %v1177_v33 = vpack.i.bf16 %v1424_v10, %v1419_v8 }
  0xf6   : > { %v390_v36 = vmax.f32 %v334_v32, 0.0  ;;  %v337_v37 = vadd.f32 %v972_v35, %v878_v30  ;;  %v328_v38 = vpop.f32.mrb[3].mxu0  ;;  %v1167_v32 = vpack.i.bf16 %v1416_v7, %v1413_v6  ;;  %v1207_v35 = vpack.i.bf16 %v1449_v18, %v1446_v17 }
  0xf7   : > { %v388_v39 = vmax.f32 %v326_v34, 0.0  ;;  %v329_v40 = vadd.f32 %v878_v30, %v328_v38  ;;  %v1197_v34 = vpack.i.bf16 %v1443_v16, %v1440_v15  ;;  %v1237_v38 = vpack.i.bf16 %v1479_v28, %v1476_v27 }
  0xf8   : > { %424 = vrot.lane.b32.xlu1 %v390_v36, %s1313_s16  ;;  %v391_v41 = vmax.f32 %v337_v37, 0.0  ;;  %v1217_v36 = vpack.i.bf16 %v1461_v22, %v1458_v21  ;;  %v1227_v37 = vpack.i.bf16 %v1467_v24, %v1464_v23 }
  0xf9   : > { %420 = vrot.lane.b32.xlu0 %v388_v39, %s1313_s16  ;;  %v389_v42 = vmax.f32 %v329_v40, 0.0  ;;  %v1315_v39 = vmov 0.0|0.0  }
  0xfa   : > { %1055 = vmatprep.subr.bf16.mxu1 %v1315_v39  ;;  %1087 = vmatprep.subr.bf16.mxu0 %v1315_v39 }
  0xfb   : > { %v975_v43 = vpop.f32.mrb[4].mxu0 }
  0xfc   : > { %426 = vrot.lane.b32.xlu1 %v391_v41, %s1313_s16  ;;  %v341_v44 = vpop.f32.mrb[5].mxu0  ;;  %v350_v45 = vadd.f32 %v975_v43, %v878_v30 }
  0xfd   : > { %422 = vrot.lane.b32.xlu0 %v389_v42, %s1313_s16  ;;  %v342_v46 = vadd.f32 %v878_v30, %v341_v44  ;;  %v976_v47 = vpop.f32.mrb[6].mxu0 }
  0xfe   : > { %v344_v48 = vpop.f32.mrb[7].mxu0  ;;  %v353_v50 = vadd.f32 %v976_v47, %v878_v30  ;;  %v394_v52 = vmax.f32 %v350_v45, 0.0 }
  0xff   : > { %v392_v49 = vmax.f32 %v342_v46, 0.0  ;;  %v345_v51 = vadd.f32 %v878_v30, %v344_v48 }
 0x100   : > { %v395_v54 = vmax.f32 %v353_v50, 0.0 }
 0x101   : > { %v393_v53 = vmax.f32 %v345_v51, 0.0  ;;  %428 = vrot.lane.b32.xlu0 %v392_v49, %s1313_s16 }
 0x103   : > { %430 = vrot.lane.b32.xlu1 %v393_v53, %s1313_s16  ;;  %v979_v55 = vpop.f32.mrb[8].mxu0 }
 0x104   : > { %v357_v56 = vpop.f32.mrb[9].mxu0  ;;  %v366_v57 = vadd.f32 %v979_v55, %v878_v30 }
 0x105   : > { %432 = vrot.lane.b32.xlu0 %v394_v52, %s1313_s16  ;;  %v358_v58 = vadd.f32 %v878_v30, %v357_v56  ;;  %v980_v59 = vpop.f32.mrb[10].mxu0 }
 0x106   : > { %v360_v60 = vpop.f32.mrb[11].mxu0  ;;  %v369_v62 = vadd.f32 %v980_v59, %v878_v30  ;;  %v398_v0 = vmax.f32 %v366_v57, 0.0 }
 0x107   : > { %434 = vrot.lane.b32.xlu1 %v395_v54, %s1313_s16  ;;  %v396_v61 = vmax.f32 %v358_v58, 0.0  ;;  %v361_v63 = vadd.f32 %v878_v30, %v360_v60 }
 0x108   : > { %v399_v2 = vmax.f32 %v369_v62, 0.0 }
 0x109   : > { %v397_v1 = vmax.f32 %v361_v63, 0.0  ;;  %436 = vrot.lane.b32.xlu0 %v396_v61, %s1313_s16 }
 0x10b   : > { %438 = vrot.lane.b32.xlu1 %v397_v1, %s1313_s16  ;;  %v983_v3 = vpop.f32.mrb[12].mxu0 }
 0x10c   : > { %v373_v4 = vpop.f32.mrb[13].mxu0  ;;  %v382_v5 = vadd.f32 %v983_v3, %v878_v30 }
 0x10d   : > { %440 = vrot.lane.b32.xlu0 %v398_v0, %s1313_s16  ;;  %v374_v9 = vadd.f32 %v878_v30, %v373_v4  ;;  %v984_v13 = vpop.f32.mrb[14].mxu0 }
 0x10e   : > { %v376_v14 = vpop.f32.mrb[15].mxu0  ;;  %v385_v20 = vadd.f32 %v984_v13, %v878_v30  ;;  %v402_v26 = vmax.f32 %v382_v5, 0.0 }
 0x10f   : > { %442 = vrot.lane.b32.xlu1 %v399_v2, %s1313_s16  ;;  %v400_v19 = vmax.f32 %v374_v9, 0.0  ;;  %v377_v25 = vadd.f32 %v878_v30, %v376_v14  ;;  %v1187_v30 = vpack.i.bf16 %v1430_v12, %v1427_v11 }
 0x110   : > { %v403_v31 = vmax.f32 %v385_v20, 0.0 }
 0x111   : > { %v401_v29 = vmax.f32 %v377_v25, 0.0  ;;  %444 = vrot.lane.b32.xlu0 %v400_v19, %s1313_s16 }
 0x113   : > { %446 = vrot.lane.b32.xlu1 %v401_v29, %s1313_s16 }
 0x115   : > { %448 = vrot.lane.b32.xlu0 %v402_v26, %s1313_s16 }
 0x117   : > { %450 = vrot.lane.b32.xlu1 %v403_v31, %s1313_s16 }
 0x119   : > { %1168 = vrot.lane.b32.xlu0 %v1167_v32, %s1314_s17 }
 0x11d   : > { %1178 = vrot.lane.b32.xlu0 %v1177_v33, %s1314_s17 }
 0x121   : > { %1188 = vrot.lane.b32.xlu0 %v1187_v30, %s1314_s17  ;;  %v1318_v30 = vmov 0.0  }
 0x122   : > { %1017 = vmatprep.mubr.msk.f32.mxu1 %vm1317_vm5, %v1318_v30  ;;  %1052 = vmatprep.mubr.msk.f32.mxu0 %vm1317_vm5, %v1318_v30 }
 0x125   : > { %1198 = vrot.lane.b32.xlu0 %v1197_v34, %s1314_s17 }
 0x129   : > { %1208 = vrot.lane.b32.xlu0 %v1207_v35, %s1314_s17 }
 0x12d   : > { %1218 = vrot.lane.b32.xlu0 %v1217_v36, %s1314_s17 }
 0x131   : > { %1228 = vrot.lane.b32.xlu0 %v1227_v37, %s1314_s17  ;;  %v792_v37 = vld [vmem:[#allocation2] sm:$0x1] }
 0x135   : > { %1238 = vrot.lane.b32.xlu0 %v1237_v38, %s1314_s17  ;;  %v1319_v38 = vmov 0  }
 0x136   : > { %1247 = vset.pattern.permute.xlu0 %v1319_v38 }
 0x139   : > { %795 = vperm.xlu0 %1247, %v792_v37  }
 0x16a   : > { %v425_v40 = vpop.permute.xlu1 %424 }
 0x16b   : > { %v421_v41 = vpop.permute.xlu0 %420  ;;  %v470_v49 = vmul.f32 %v425_v40, %v1419_v8 }
 0x16c   : > { %v468_v44 = vmul.f32 %v421_v41, %v1413_v6 }
 0x16e   : > { %v427_v42 = vpop.permute.xlu1 %426 }
 0x16f   : > { %v423_v43 = vpop.permute.xlu0 %422  ;;  %v471_v46 = vmul.f32 %v427_v42, %v1424_v10 }
 0x170   : > { %v469_v45 = vmul.f32 %v423_v43, %v1416_v7 }
 0x171   : > { %v1182_v52 = vpack.i.bf16 %v471_v46, %v470_v49 }
 0x172   : > { %v1172_v47 = vpack.i.bf16 %v469_v45, %v468_v44 }
 0x173   : > { %v429_v48 = vpop.permute.xlu0 %428 }
 0x174   : > { %1173 = vrot.lane.b32.xlu1 %v1172_v47, %s1316_s18  ;;  %v472_v50 = vmul.f32 %v429_v48, %v1427_v11 }
 0x175   : > { %v431_v51 = vpop.permute.xlu1 %430 }
 0x176   : > { %v473_v53 = vmul.f32 %v431_v51, %v1430_v12 }
 0x177   : > { %v433_v54 = vpop.permute.xlu0 %432 }
 0x178   : > { %1183 = vrot.lane.b32.xlu1 %v1182_v52, %s1316_s18  ;;  %v1192_v6 = vpack.i.bf16 %v473_v53, %v472_v50  ;;  %v474_v7 = vmul.f32 %v433_v54, %v1440_v15  ;;  %v484_v53 = vld [vmem:[%s1652_s3] sm:$0x1] }
 0x179   : > { %v435_v10 = vpop.permute.xlu1 %434 }
 0x17a   : > { %v475_v55 = vmul.f32 %v435_v10, %v1443_v16 }
 0x17b   : > { %v437_v56 = vpop.permute.xlu0 %436 }
 0x17c   : > { %v1202_v8 = vpack.i.bf16 %v475_v55, %v474_v7  ;;  %1193 = vrot.lane.b32.xlu1 %v1192_v6, %s1316_s18  ;;  %v476_v57 = vmul.f32 %v437_v56, %v1446_v17 }
 0x17d   : > { %v439_v11 = vpop.permute.xlu1 %438 }
 0x17e   : > { %v477_v58 = vmul.f32 %v439_v11, %v1449_v18 }
 0x17f   : > { %v441_v59 = vpop.permute.xlu0 %440 }
 0x180   : > { %1203 = vrot.lane.b32.xlu1 %v1202_v8, %s1316_s18  ;;  %v1212_v12 = vpack.i.bf16 %v477_v58, %v476_v57  ;;  %v478_v60 = vmul.f32 %v441_v59, %v1458_v21 }
 0x181   : > { %v443_v61 = vpop.permute.xlu1 %442 }
 0x182   : > { %v479_v15 = vmul.f32 %v443_v61, %v1461_v22 }
 0x183   : > { %v445_v62 = vpop.permute.xlu0 %444 }
 0x184   : > { %v1222_v16 = vpack.i.bf16 %v479_v15, %v478_v60  ;;  %1213 = vrot.lane.b32.xlu1 %v1212_v12, %s1316_s18  ;;  %v480_v63 = vmul.f32 %v445_v62, %v1464_v23 }
 0x185   : > { %v447_v0 = vpop.permute.xlu1 %446 }
 0x186   : > { %v481_v17 = vmul.f32 %v447_v0, %v1467_v24 }
 0x187   : > { %v449_v1 = vpop.permute.xlu0 %448 }
 0x188   : > { %1223 = vrot.lane.b32.xlu1 %v1222_v16, %s1316_s18  ;;  %v1232_v18 = vpack.i.bf16 %v481_v17, %v480_v63  ;;  %v482_v2 = vmul.f32 %v449_v1, %v1476_v27 }
 0x189   : > { %v451_v3 = vpop.permute.xlu1 %450 }
 0x18a   : > { %v483_v21 = vmul.f32 %v451_v3, %v1479_v28 }
 0x18b   : > { %v1169_v22 = vpop.permute.xlu0 %1168 }
 0x18c   : > { %v1242_v4 = vpack.i.bf16 %v483_v21, %v482_v2  ;;  %1233 = vrot.lane.b32.xlu1 %v1232_v18, %s1316_s18  ;;  %v1171_v5 = vunpack.i.h.bf16 %v1169_v22  ;;  %v1170_v9 = vunpack.i.l.bf16 %v1169_v22 }
 0x18e   : > { %v1056_v24 = vpack.c.bf16 %v1171_v5, %v1170_v9 }
 0x18f   : > { %v1179_v13 = vpop.permute.xlu0 %1178 }
 0x190   : > { %1243 = vrot.lane.b32.xlu1 %v1242_v4, %s1316_s18  ;;  %1058 = vmatpush3.bf16.xpose.msk.msra.mxu1 %vm1546_vm4, %v1056_v24  ;;  %v1181_v27 = vunpack.i.h.bf16 %v1179_v13  ;;  %v1180_v28 = vunpack.i.l.bf16 %v1179_v13 }
 0x191   : > { %1059 = vmatprep.subr.bf16.mxu1 %v1315_v39 }
 0x192   : > { %v1060_v14 = vpack.c.bf16 %v1181_v27, %v1180_v28  ;;  %v1320_v28 = vmov 1.0  }
 0x193   : > { %v1189_v19 = vpop.permute.xlu0 %1188 }
 0x194   : > { %v1191_v20 = vunpack.i.h.bf16 %v1189_v19  ;;  %v1190_v25 = vunpack.i.l.bf16 %v1189_v19 }
 0x196   : > { %v1064_v26 = vpack.c.bf16 %v1191_v20, %v1190_v25  ;;  %v798_v20 = vlaneseq }
 0x197   : > { %v1199_v29 = vpop.permute.xlu0 %1198 }
 0x198   : > { %1062 = vmatpush3.bf16.xpose.msk.msra.mxu1 %vm1546_vm4, %v1060_v14  ;;  %v1201_v31 = vunpack.i.h.bf16 %v1199_v29  ;;  %v1200_v32 = vunpack.i.l.bf16 %v1199_v29  ;;  %v799_v25 = vshrl.u32 %v798_v20, 7 }
 0x199   : > { %1063 = vmatprep.subr.bf16.mxu1 %v1315_v39 }
 0x19a   : > { %v1068_v33 = vpack.c.bf16 %v1201_v31, %v1200_v32 }
 0x19b   : > { %v1209_v34 = vpop.permute.xlu0 %1208 }
 0x19c   : > { %v1211_v35 = vunpack.i.h.bf16 %v1209_v34  ;;  %v1210_v36 = vunpack.i.l.bf16 %v1209_v34 }
 0x19e   : > { %v1072_v40 = vpack.c.bf16 %v1211_v35, %v1210_v36 }
 0x19f   : > { %v1219_v41 = vpop.permute.xlu0 %1218 }
 0x1a0   : > { %1066 = vmatpush3.bf16.xpose.msk.msra.mxu1 %vm1546_vm4, %v1064_v26  ;;  %v1221_v42 = vunpack.i.h.bf16 %v1219_v41  ;;  %v1220_v43 = vunpack.i.l.bf16 %v1219_v41  ;;  %v800_v26 = vsub.s32 0, %v799_v25 }
 0x1a1   : > { %1067 = vmatprep.subr.bf16.mxu1 %v1315_v39 }
 0x1a2   : > { %v1076_v44 = vpack.c.bf16 %v1221_v42, %v1220_v43 }
 0x1a3   : > { %v1229_v45 = vpop.permute.xlu0 %1228 }
 0x1a4   : > { %v1231_v46 = vunpack.i.h.bf16 %v1229_v45  ;;  %v1230_v47 = vunpack.i.l.bf16 %v1229_v45 }
 0x1a6   : > { %v1080_v48 = vpack.c.bf16 %v1231_v46, %v1230_v47 }
 0x1a7   : > { %v1239_v49 = vpop.permute.xlu0 %1238 }
 0x1a8   : > { %1070 = vmatpush3.bf16.xpose.msk.msra.mxu1 %vm1546_vm4, %v1068_v33  ;;  %v1241_v50 = vunpack.i.h.bf16 %v1239_v49  ;;  %v1240_v51 = vunpack.i.l.bf16 %v1239_v49 }
 0x1a9   : > { %1071 = vmatprep.subr.bf16.mxu1 %v1315_v39 }
 0x1aa   : > { %v1084_v52 = vpack.c.bf16 %v1241_v50, %v1240_v51 }
 0x1b0   : > { %1074 = vmatpush3.bf16.xpose.msk.msra.mxu1 %vm1546_vm4, %v1072_v40 }
 0x1b1   : > { %1075 = vmatprep.subr.bf16.mxu1 %v1315_v39 }
 0x1b8   : > { %1078 = vmatpush3.bf16.xpose.msk.msra.mxu1 %vm1546_vm4, %v1076_v44  ;;  %v796_v29 = vpop.permute.xlu0 %795 }
 0x1b9   : > { %1079 = vmatprep.subr.bf16.mxu1 %v1315_v39  ;;  %v801_v31 = vrot.slane %v796_v29, %v800_v26 }
 0x1c0   : > { %1082 = vmatpush3.bf16.xpose.msk.msra.mxu1 %vm1546_vm4, %v1080_v48 }
 0x1c1   : > { %1083 = vmatprep.subr.bf16.mxu1 %v1315_v39 }
 0x1c8   : > { %1086 = vmatpush3.bf16.xpose.msk.msra.mxu1 %vm1546_vm4, %v1084_v52 }
 0x1cf   : > { %1018 = vmatmul.mubr.msk.f32.vlgmr.msra.gmra.mrb[0].mxu1 %vm533_vm3, %v484_v53 }
 0x1e6   : > { %v1174_v54 = vpop.permute.xlu1 %1173 }
 0x1e7   : > { %v1176_v6 = vunpack.i.h.bf16 %v1174_v54  ;;  %v1175_v7 = vunpack.i.l.bf16 %v1174_v54 }
 0x1e9   : > { %v1088_v10 = vpack.c.bf16 %v1176_v6, %v1175_v7 }
 0x1ea   : > { %v1184_v55 = vpop.permute.xlu1 %1183 }
 0x1eb   : > { %1090 = vmatpush3.bf16.xpose.msk.msra.mxu0 %vm1546_vm4, %v1088_v10  ;;  %v1186_v56 = vunpack.i.h.bf16 %v1184_v55  ;;  %v1185_v8 = vunpack.i.l.bf16 %v1184_v55 }
 0x1ec   : > { %1091 = vmatprep.subr.bf16.mxu0 %v1315_v39 }
 0x1ed   : > { %v1092_v57 = vpack.c.bf16 %v1186_v56, %v1185_v8 }
 0x1ee   : > { %v1194_v11 = vpop.permute.xlu1 %1193 }
 0x1ef   : > { %v1196_v58 = vunpack.i.h.bf16 %v1194_v11  ;;  %v1195_v59 = vunpack.i.l.bf16 %v1194_v11 }
 0x1f1   : > { %v1096_v12 = vpack.c.bf16 %v1196_v58, %v1195_v59 }
 0x1f2   : > { %v1204_v60 = vpop.permute.xlu1 %1203 }
 0x1f3   : > { %1094 = vmatpush3.bf16.xpose.msk.msra.mxu0 %vm1546_vm4, %v1092_v57  ;;  %v1206_v61 = vunpack.i.h.bf16 %v1204_v60  ;;  %v1205_v15 = vunpack.i.l.bf16 %v1204_v60 }
 0x1f4   : > { %1095 = vmatprep.subr.bf16.mxu0 %v1315_v39 }
 0x1f5   : > { %v1100_v62 = vpack.c.bf16 %v1206_v61, %v1205_v15 }
 0x1f6   : > { %v1214_v16 = vpop.permute.xlu1 %1213 }
 0x1f7   : > { %v1216_v63 = vunpack.i.h.bf16 %v1214_v16  ;;  %v1215_v0 = vunpack.i.l.bf16 %v1214_v16 }
 0x1f9   : > { %v1104_v17 = vpack.c.bf16 %v1216_v63, %v1215_v0 }
 0x1fa   : > { %v1224_v1 = vpop.permute.xlu1 %1223 }
 0x1fb   : > { %1098 = vmatpush3.bf16.xpose.msk.msra.mxu0 %vm1546_vm4, %v1096_v12  ;;  %v1226_v18 = vunpack.i.h.bf16 %v1224_v1  ;;  %v1225_v2 = vunpack.i.l.bf16 %v1224_v1 }
 0x1fc   : > { %1099 = vmatprep.subr.bf16.mxu0 %v1315_v39 }
 0x1fd   : > { %v1108_v3 = vpack.c.bf16 %v1226_v18, %v1225_v2 }
 0x1fe   : > { %v1234_v21 = vpop.permute.xlu1 %1233 }
 0x1ff   : > { %v1236_v22 = vunpack.i.h.bf16 %v1234_v21  ;;  %v1235_v4 = vunpack.i.l.bf16 %v1234_v21 }
 0x201   : > { %v1112_v5 = vpack.c.bf16 %v1236_v22, %v1235_v4 }
 0x202   : > { %v1244_v9 = vpop.permute.xlu1 %1243 }
 0x203   : > { %1102 = vmatpush3.bf16.xpose.msk.msra.mxu0 %vm1546_vm4, %v1100_v62  ;;  %v1246_v24 = vunpack.i.h.bf16 %v1244_v9  ;;  %v1245_v13 = vunpack.i.l.bf16 %v1244_v9 }
 0x204   : > { %1103 = vmatprep.subr.bf16.mxu0 %v1315_v39 }
 0x205   : > { %v1116_v27 = vpack.c.bf16 %v1246_v24, %v1245_v13 }
 0x20b   : > { %1106 = vmatpush3.bf16.xpose.msk.msra.mxu0 %vm1546_vm4, %v1104_v17 }
 0x20c   : > { %1107 = vmatprep.subr.bf16.mxu0 %v1315_v39 }
 0x213   : > { %1110 = vmatpush3.bf16.xpose.msk.msra.mxu0 %vm1546_vm4, %v1108_v3 }
 0x214   : > { %1111 = vmatprep.subr.bf16.mxu0 %v1315_v39 }
 0x21b   : > { %1114 = vmatpush3.bf16.xpose.msk.msra.mxu0 %vm1546_vm4, %v1112_v5 }
 0x21c   : > { %1115 = vmatprep.subr.bf16.mxu0 %v1315_v39 }
 0x223   : > { %1118 = vmatpush3.bf16.xpose.msk.msra.mxu0 %vm1546_vm4, %v1116_v27 }
 0x22a   : > { %1053 = vmatmul.mubr.msk.f32.vlgmr.msra.gmra.mrb[16].mxu0 %vm533_vm3, %v1320_v28 }
 0x2a2   : > { %v635_v14 = vpop.f32.mrb[0].mxu1 }
 0x2a3   : > { %v1019_v19 = vpop.f32.mrb[1].mxu1 }
 0x2fd   : > { %v788_v39 = vpop.f32.mrb[16].mxu0 }
 0x2fe   : > { %v789_v32 = vadd.f32 %v788_v39, %v635_v14  ;;  %v1054_v33 = vpop.f32.mrb[17].mxu0 }
 0x300   : > { %v802_v23 = vadd.f32 %v801_v31, %v789_v32 }
 0x302   : > { %803 = vst [vmem:[%s219_s26] sm:$0x1] %v802_v23 }
 0x303   : > { %1261 = shalt.err (!%p1258_p3)
}
 0x304   : > { %s1262_s8 = scalar_lea.hbm %s1607_s9, 16  ;;  %s1266_s17 = scalar_lea.hbm %s1654_s5, 32 }
 0x305   : > { %p1263_p4 = scmp.ne.s32.totalorder %s1607_s9, %s1262_s8  ;;  %p1267_p9 = scmp.lt.u32.totalorder %s1607_s9, %s1654_s5 }
 0x306   : > { %p1268_p10 = scmp.lt.u32.totalorder %s1266_s17, %s1262_s8  ;;  %p1270_p12 = scmp.lt.u32.totalorder %s1262_s8, %s1607_s9 }
 0x307   : > { %p1264_p7 = pnand %p1263_p4, %p1390_p5 }
 0x308   : > { %p1269_p11 = por %p1268_p10, %p1267_p9 }
 0x309   : > { %p1265_p8 = pneg %p1264_p7 }
 0x30a   : > { %p1271_p13 = por %p1270_p12, %p1269_p11 }
 0x30c   : > { %p1272_p0 = pnand %p1271_p13, %p1265_p8 }
 0x30e   : > { %1275 = shalt.err (!%p1272_p0)
}
 0x30f   : > { %1119 = dma.vmem_to_hbm [thread:$0]  (%p1390_p5), %s1609_s27, 16, %s1607_s9, %s805_s10  }
 0x310 PF: > { %p1125_p1 = scmp.ge.s32.totalorder %s1310_s23, 2  ;;  %s829_s4 = sand.u32 1, %s1298_s20  }
 0x311   : > { %s830_s24 = scalar_lea.sflag [#allocation4], %s829_s4 }
 0x312   : > { %p1122_p2 = pnand %p1125_p1, %p1394_p6 }
 0x314   : > { %1293 = dma.done.wait (!%p1122_p2), %s830_s24, 16  }
 0x315   : > { %1295 = vsyncadd (!%p1122_p2), %s830_s24, 4294967280  ;;  %p17_p3 = scmp.ge.s32.totalorder %s1378_s25, 4   ;;  %s1659_s20 = smov %s1302_s21 }
 0x316   : > { %s1660_s21 = smov %s1306_s22  ;;  %s1661_s22 = smov %s1388_s28 }
 0x317   : > { %s1662_s23 = smov %s1378_s25  ;;  %19 = sbr.rel (!%p17_p3) target bundleno = 6 (0x6), region = 75 }
 0x31e   :  { %834 = vsyncpa [#allocation4], 1 }
 0x31f   :  { %836 = vsyncpa [#allocation4 + $0x1], 1 }

</bundles_post_ra>
